<compile_context>
chip_gen: v7x
topology: tpu7x:2x2x1
jax: 0.10.0
libtpu: 0.0.40
codegen_flags: <defaults>
</compile_context>

<pallas_src>
import functools

import numpy as np

import jax
import jax.numpy as jnp
from jax.experimental import pallas as pl
from jax.experimental.pallas import tpu as pltpu


# --------------------------------------------------------------------------
# Constant construction (hoisted out of the jit; cached across calls).
# --------------------------------------------------------------------------
@functools.lru_cache(maxsize=8)
def _lfm_constants(h, w, sigma):
    """Masked forward-DFT matrix [Krm | Kim], scaled inverse-DFT matrices
    Kri/Kii (1/(h*w) folded in), and the column sums used to fold the conv2
    bias through the inverse DFT.  Built in float64 numpy, shipped in bf16."""
    hw = h * w

    def dft(n):
        k = np.arange(n, dtype=np.float64)
        ang = -2.0 * np.pi * np.outer(k, k) / n
        return np.cos(ang), np.sin(ang)

    fhr, fhi = dft(h)
    fwr, fwi = dft(w)
    # Complex Kronecker DFT: row_vec(fft2(X)) = row_vec(X) @ (Fh ⊗ Fw).
    kr = np.kron(fhr, fwr) - np.kron(fhi, fwi)          # (hw, hw)
    ki = np.kron(fhr, fwi) + np.kron(fhi, fwr)

    # Gaussian high-pass mask folded onto the output columns of the fwd DFT.
    yv, xv = np.meshgrid(np.arange(h, dtype=np.float64),
                         np.arange(w, dtype=np.float64), indexing="ij")
    g = np.exp(-(((yv - h // 2) ** 2 + (xv - w // 2) ** 2) /
                 (2.0 * sigma * sigma)))
    mask = (1.0 - g).reshape(hw)

    kfwd = np.concatenate([kr * mask[None, :], ki * mask[None, :]], axis=1)
    kri = kr / hw                                       # Re(ifft) = Yr@kri + Yi@kii
    kii = ki / hw
    s_r = kri.sum(axis=0)                               # 1^T @ kri  (for conv2 bias)
    s_i = kii.sum(axis=0)

    return (jnp.asarray(kfwd, jnp.bfloat16),
            jnp.asarray(kri, jnp.bfloat16),
            jnp.asarray(kii, jnp.bfloat16),
            jnp.asarray(s_r, jnp.float32),
            jnp.asarray(s_i, jnp.float32))


def _pick_images_per_step(b, c, target_m=256):
    """Fold images into the matmul M dim: smallest divisor of b with
    bt*c >= target_m (whole batch if none); keep >=2 grid steps (v7x
    megacore) only when that still leaves M >= target_m."""
    bt = b
    for d in range(1, b + 1):
        if b % d == 0 and d * c >= target_m:
            bt = d
            break
    if bt == b and b % 2 == 0 and (b // 2) * c >= target_m:
        bt = b // 2
    return bt


# --------------------------------------------------------------------------
# Kernel body: 5 lane-dense MXU dots per grid step.
# --------------------------------------------------------------------------
def _lfm_kernel(x_ref, kfwd_ref, kri_ref, kii_ref,
                w1_ref, b1_ref, w2_ref, bias_ref, out_ref):
    f32, bf16 = jnp.float32, jnp.bfloat16
    hw = kri_ref.shape[0]
    m = x_ref.shape[0]                                   # bt * c rows

    x = x_ref[...]                                       # (m, hw) f32

    # Masked forward 2-D DFT: ONE fused dot -> [Yr | Yi]  (m, 2hw).
    y = jnp.dot(x.astype(bf16), kfwd_ref[...], preferred_element_type=f32)

    # Per-image cat([real, imag], dim=channel) realised as a row-stack of the
    # folded batch (lane slices at hw are 128-aligned for typical sizes).
    yf = jnp.concatenate([y[:, :hw], y[:, hw:]], axis=0).astype(bf16)   # (2m, hw)

    # conv1 (1x1) + bias + ReLU: single block-diagonal channel-mixing dot.
    h1 = jnp.maximum(
        jnp.dot(w1_ref[...], yf, preferred_element_type=f32) + b1_ref[...],
        0.0)

    # conv2 (1x1): single dot emitting row-stacked [real ; imag] spectral
    # planes (its bias is folded into bias_ref via the inverse DFT).
    h2 = jnp.dot(w2_ref[...], h1.astype(bf16), preferred_element_type=f32)
    h2r = h2[:m].astype(bf16)
    h2i = h2[m:].astype(bf16)

    # Real part of the inverse 2-D DFT (1/(h*w) already folded into kri/kii),
    # residual add, and the precomputed conv2-bias plane.  Single lane-dense store.
    z = (jnp.dot(h2r, kri_ref[...], preferred_element_type=f32)
         + jnp.dot(h2i, kii_ref[...], preferred_element_type=f32))
    out_ref[...] = x + z + bias_ref[...]


# --------------------------------------------------------------------------
# Wrapper
# --------------------------------------------------------------------------
def _nbytes(a):
    return int(a.size) * int(a.dtype.itemsize)


@jax.jit
def _lfm_forward_jit(x, w1, b1, w2, b2, kfwd, kri, kii, s_r, s_i):
    f32, bf16 = jnp.float32, jnp.bfloat16
    b, c, h, w = x.shape
    hw = h * w
    bt = _pick_images_per_step(b, c)
    m = bt * c
    steps = b // bt

    x_flat = x.astype(f32).reshape(b * c, hw)            # lane-dense (rows = images*channels)

    # Block-diagonal 1x1-conv weights so the per-image channel mix works with
    # the batch folded into matmul rows.  Column/row order matches the
    # row-stacked [real ; imag] layout used in the kernel.
    w1 = w1.astype(f32)
    w2 = w2.astype(f32)
    eye = jnp.eye(bt, dtype=f32)
    w1_bd = jnp.concatenate([jnp.kron(eye, w1[:, :c]), jnp.kron(eye, w1[:, c:])],
                            axis=1).astype(bf16)          # (2m, 2m)
    w2_bd = jnp.concatenate([jnp.kron(eye, w2[:c, :]), jnp.kron(eye, w2[c:, :])],
                            axis=0).astype(bf16)          # (2m, 2m)

    # conv1 bias as a full lane-dense plane (avoids lane-width-1 refs).
    b1_plane = jnp.broadcast_to(
        jnp.tile(b1.astype(f32).reshape(2 * c, 1), (bt, 1)), (2 * m, hw))
    # conv2 bias folded through the inverse DFT into a constant output plane.
    b2 = b2.astype(f32)
    bias_img = b2[:c, None] * s_r[None, :] + b2[c:, None] * s_i[None, :]   # (c, hw)
    bias_plane = jnp.tile(bias_img, (bt, 1))                                # (m, hw)

    consts = (kfwd, kri, kii, w1_bd, b1_plane, w2_bd, bias_plane)
    const_bytes = sum(_nbytes(a) for a in consts)
    # Single-buffer the constant inputs only once they are big enough to
    # matter (large h*w); the small-shape path never touches pipeline_mode.
    single_buffer = const_bytes > (8 << 20)

    def const_spec(shape):
        if single_buffer:
            return pl.BlockSpec(shape, lambda i: (0, 0),
                                pipeline_mode=pl.Buffered(1))
        return pl.BlockSpec(shape, lambda i: (0, 0))

    flops = 2 * steps * (m * hw * 2 * hw                  # forward DFT
                         + (2 * m) * (2 * m) * hw         # conv1
                         + (2 * m) * (2 * m) * hw         # conv2
                         + 2 * m * hw * hw)               # inverse DFT
    bytes_accessed = 2 * _nbytes(x_flat) + const_bytes
    cost = pl.CostEstimate(flops=int(flops), transcendentals=0,
                           bytes_accessed=int(bytes_accessed))

    cp_kwargs = dict(dimension_semantics=("parallel",))
    # Per-step VMEM: double-buffered in/out tiles + constants (x2 unless
    # single-buffered).  Raise the scoped limit only when it is actually needed.
    tile_bytes = 2 * 2 * m * hw * 4
    vmem_needed = tile_bytes + const_bytes * (1 if single_buffer else 2) + (2 << 20)
    if vmem_needed > (24 << 20):
        cp_kwargs["vmem_limit_bytes"] = int(min(vmem_needed, 100 << 20))

    out_flat = pl.pallas_call(
        _lfm_kernel,
        out_shape=jax.ShapeDtypeStruct((b * c, hw), f32),
        grid=(steps,),
        in_specs=[
            pl.BlockSpec((m, hw), lambda i: (i, 0)),       # x (bt images / step)
            const_spec(kfwd.shape),                        # [Krm | Kim]
            const_spec(kri.shape),
            const_spec(kii.shape),
            const_spec(w1_bd.shape),
            const_spec(b1_plane.shape),
            const_spec(w2_bd.shape),
            const_spec(bias_plane.shape),
        ],
        out_specs=pl.BlockSpec((m, hw), lambda i: (i, 0)),
        compiler_params=pltpu.CompilerParams(**cp_kwargs),
        cost_estimate=cost,
    )(x_flat, kfwd, kri, kii, w1_bd, b1_plane, w2_bd, bias_plane)

    return out_flat.reshape(b, c, h, w)


def lfm_forward(x, sigma, w1, b1, w2, b2):
    """LFM forward pass.  `sigma` is treated as a static Python float."""
    _, _, h, w = x.shape
    kfwd, kri, kii, s_r, s_i = _lfm_constants(int(h), int(w), float(sigma))
    return _lfm_forward_jit(x, w1, b1, w2, b2, kfwd, kri, kii, s_r, s_i)


# --------------------------------------------------------------------------
# Pure-JAX reference mirroring the PyTorch forward.
# --------------------------------------------------------------------------
def lfm_reference(x, sigma, w1, b1, w2, b2):
    x = x.astype(jnp.float32)
    _, _, h, w = x.shape
    y = jnp.fft.fft2(x)
    yv, xv = jnp.meshgrid(jnp.arange(h, dtype=jnp.float32),
                          jnp.arange(w, dtype=jnp.float32), indexing="ij")
    g = jnp.exp(-(((yv - h // 2) ** 2 + (xv - w // 2) ** 2) /
                  (2.0 * float(sigma) ** 2)))
    y = y * (1.0 - g)
    yf = jnp.concatenate([jnp.real(y), jnp.imag(y)], axis=1)
    hp = jax.lax.Precision.HIGHEST
    h1 = jax.nn.relu(jnp.einsum("oi,bihw->bohw", w1, yf, precision=hp)
                     + b1.reshape(1, -1, 1, 1))
    h2 = jnp.einsum("oi,bihw->bohw", w2, h1, precision=hp) + b2.reshape(1, -1, 1, 1)
    yr, yi = jnp.split(h2, 2, axis=1)
    z = jnp.fft.ifft2(yr + 1j * yi)
    return x + jnp.real(z)


if __name__ == "__main__":
    B, C, H, W = 2, 4, 16, 16
    C2 = 2 * C
    sigma = 3.0

    key = jax.random.PRNGKey(0)
    kx, k1, k2, k3, k4 = jax.random.split(key, 5)
    x = jax.random.normal(kx, (B, C, H, W), jnp.float32)
    # Deterministic synthetic parameters (conv1/conv2: 1x1, 2C -> 2C).
    w1 = jax.random.normal(k1, (C2, C2), jnp.float32) / jnp.sqrt(float(C2))
    b1 = jax.random.normal(k2, (C2,), jnp.float32) * 0.1
    w2 = jax.random.normal(k3, (C2, C2), jnp.float32) / jnp.sqrt(float(C2))
    b2 = jax.random.normal(k4, (C2,), jnp.float32) * 0.1

    out = jax.block_until_ready(lfm_forward(x, sigma, w1, b1, w2, b2))

    ref = lfm_reference(x, sigma, w1, b1, w2, b2)
    err = float(jnp.max(jnp.abs(out - ref)))
    # bf16 MXU inputs / f32 accumulation: absolute floor plus relative headroom.
    tol = max(5e-2, 5e-3 * float(jnp.max(jnp.abs(ref))))
    assert out.shape == x.shape and out.dtype == jnp.float32
    assert err < tol, f"max abs error vs reference: {err} (tol {tol})"
    print("KERNEL_OK")
</pallas_src>

<mosaic_0001>
module attributes {stable_mosaic.version = 11 : i64} {
  func.func @_lfm_kernel(%arg0: i32, %arg1: memref<8x256xf32, #tpu.memory_space<vmem>>, %arg2: memref<256x512xbf16, #tpu.memory_space<vmem>>, %arg3: memref<256x256xbf16, #tpu.memory_space<vmem>>, %arg4: memref<256x256xbf16, #tpu.memory_space<vmem>>, %arg5: memref<16x16xbf16, #tpu.memory_space<vmem>>, %arg6: memref<16x256xf32, #tpu.memory_space<vmem>>, %arg7: memref<16x16xbf16, #tpu.memory_space<vmem>>, %arg8: memref<8x256xf32, #tpu.memory_space<vmem>>, %arg9: memref<8x256xf32, #tpu.memory_space<vmem>>) attributes {dimension_semantics = [#tpu.dimension_semantics<parallel>], iteration_bounds = array<i64: 1>, scalar_prefetch = 0 : i64, scratch_operands = 0 : i64, tpu.core_type = #tpu.core_type<tc>, window_params = [{transform_indices = @transform_0, window_bounds = array<i64: 8, 256>}, {pipeline_mode = #tpu.pipeline_mode<synchronous>, transform_indices = @transform_1, window_bounds = array<i64: 256, 512>}, {pipeline_mode = #tpu.pipeline_mode<synchronous>, transform_indices = @transform_2, window_bounds = array<i64: 256, 256>}, {pipeline_mode = #tpu.pipeline_mode<synchronous>, transform_indices = @transform_3, window_bounds = array<i64: 256, 256>}, {pipeline_mode = #tpu.pipeline_mode<synchronous>, transform_indices = @transform_4, window_bounds = array<i64: 16, 16>}, {pipeline_mode = #tpu.pipeline_mode<synchronous>, transform_indices = @transform_5, window_bounds = array<i64: 16, 256>}, {pipeline_mode = #tpu.pipeline_mode<synchronous>, transform_indices = @transform_6, window_bounds = array<i64: 16, 16>}, {pipeline_mode = #tpu.pipeline_mode<synchronous>, transform_indices = @transform_7, window_bounds = array<i64: 8, 256>}, {transform_indices = @transform_8, window_bounds = array<i64: 8, 256>}]} {
    %c0 = arith.constant 0 : index
    %c0_0 = arith.constant 0 : index
    %0 = vector.load %arg1[%c0, %c0_0] : memref<8x256xf32, #tpu.memory_space<vmem>>, vector<8x256xf32>
    %1 = arith.truncf %0 : vector<8x256xf32> to vector<8x256xbf16>
    %c0_1 = arith.constant 0 : index
    %c0_2 = arith.constant 0 : index
    %2 = vector.load %arg2[%c0_1, %c0_2] : memref<256x512xbf16, #tpu.memory_space<vmem>>, vector<256x512xbf16>
    %cst = arith.constant dense<0.000000e+00> : vector<8x512xf32>
    %3 = tpu.matmul %1, %2, %cst {dimension_numbers = #tpu.dot_dimension_numbers<[1], [0], [0], [1], [0, 0, 1, 1], [], []>} : vector<8x256xbf16>, vector<256x512xbf16>, vector<8x512xf32> -> vector<8x512xf32>
    %4 = vector.extract_strided_slice %3 {offsets = [0, 0], sizes = [8, 256], strides = [1, 1]} : vector<8x512xf32> to vector<8x256xf32>
    %5 = vector.extract_strided_slice %3 {offsets = [0, 256], sizes = [8, 256], strides = [1, 1]} : vector<8x512xf32> to vector<8x256xf32>
    %6 = tpu.concatenate %4, %5 in 0 : vector<8x256xf32>, vector<8x256xf32> -> vector<16x256xf32>
    %7 = arith.truncf %6 : vector<16x256xf32> to vector<16x256xbf16>
    %c0_3 = arith.constant 0 : index
    %c0_4 = arith.constant 0 : index
    %8 = vector.load %arg5[%c0_3, %c0_4] : memref<16x16xbf16, #tpu.memory_space<vmem>>, vector<16x16xbf16>
    %cst_5 = arith.constant dense<0.000000e+00> : vector<16x256xf32>
    %9 = tpu.matmul %8, %7, %cst_5 {dimension_numbers = #tpu.dot_dimension_numbers<[1], [0], [0], [1], [0, 0, 1, 1], [], []>} : vector<16x16xbf16>, vector<16x256xbf16>, vector<16x256xf32> -> vector<16x256xf32>
    %c0_6 = arith.constant 0 : index
    %c0_7 = arith.constant 0 : index
    %10 = vector.load %arg6[%c0_6, %c0_7] : memref<16x256xf32, #tpu.memory_space<vmem>>, vector<16x256xf32>
    %11 = arith.addf %9, %10 : vector<16x256xf32>
    %cst_8 = arith.constant 0.000000e+00 : f32
    %12 = vector.broadcast %cst_8 : f32 to vector<16x256xf32>
    %13 = arith.maximumf %11, %12 : vector<16x256xf32>
    %c0_9 = arith.constant 0 : index
    %c0_10 = arith.constant 0 : index
    %14 = vector.load %arg7[%c0_9, %c0_10] : memref<16x16xbf16, #tpu.memory_space<vmem>>, vector<16x16xbf16>
    %15 = arith.truncf %13 : vector<16x256xf32> to vector<16x256xbf16>
    %cst_11 = arith.constant dense<0.000000e+00> : vector<16x256xf32>
    %16 = tpu.matmul %14, %15, %cst_11 {dimension_numbers = #tpu.dot_dimension_numbers<[1], [0], [0], [1], [0, 0, 1, 1], [], []>} : vector<16x16xbf16>, vector<16x256xbf16>, vector<16x256xf32> -> vector<16x256xf32>
    %17 = vector.extract_strided_slice %16 {offsets = [0, 0], sizes = [8, 256], strides = [1, 1]} : vector<16x256xf32> to vector<8x256xf32>
    %18 = arith.truncf %17 : vector<8x256xf32> to vector<8x256xbf16>
    %19 = vector.extract_strided_slice %16 {offsets = [8, 0], sizes = [8, 256], strides = [1, 1]} : vector<16x256xf32> to vector<8x256xf32>
    %20 = arith.truncf %19 : vector<8x256xf32> to vector<8x256xbf16>
    %c0_12 = arith.constant 0 : index
    %c0_13 = arith.constant 0 : index
    %21 = vector.load %arg3[%c0_12, %c0_13] : memref<256x256xbf16, #tpu.memory_space<vmem>>, vector<256x256xbf16>
    %cst_14 = arith.constant dense<0.000000e+00> : vector<8x256xf32>
    %22 = tpu.matmul %18, %21, %cst_14 {dimension_numbers = #tpu.dot_dimension_numbers<[1], [0], [0], [1], [0, 0, 1, 1], [], []>} : vector<8x256xbf16>, vector<256x256xbf16>, vector<8x256xf32> -> vector<8x256xf32>
    %c0_15 = arith.constant 0 : index
    %c0_16 = arith.constant 0 : index
    %23 = vector.load %arg4[%c0_15, %c0_16] : memref<256x256xbf16, #tpu.memory_space<vmem>>, vector<256x256xbf16>
    %cst_17 = arith.constant dense<0.000000e+00> : vector<8x256xf32>
    %24 = tpu.matmul %20, %23, %cst_17 {dimension_numbers = #tpu.dot_dimension_numbers<[1], [0], [0], [1], [0, 0, 1, 1], [], []>} : vector<8x256xbf16>, vector<256x256xbf16>, vector<8x256xf32> -> vector<8x256xf32>
    %25 = arith.addf %22, %24 : vector<8x256xf32>
    %26 = arith.addf %0, %25 : vector<8x256xf32>
    %c0_18 = arith.constant 0 : index
    %c0_19 = arith.constant 0 : index
    %27 = vector.load %arg8[%c0_18, %c0_19] : memref<8x256xf32, #tpu.memory_space<vmem>>, vector<8x256xf32>
    %28 = arith.addf %26, %27 : vector<8x256xf32>
    %c0_20 = arith.constant 0 : index
    %c0_21 = arith.constant 0 : index
    %29 = vector.load %arg9[%c0_20, %c0_21] : memref<8x256xf32, #tpu.memory_space<vmem>>, vector<8x256xf32>
    tpu.vector_store %arg9[%c0_20, %c0_21], %28 {strides = array<i32>} : memref<8x256xf32, #tpu.memory_space<vmem>>, vector<8x256xf32>,
    return
  }
  func.func @transform_0(%arg0: i32) -> (i32, i32) {
    %c0_i32 = arith.constant 0 : i32
    %c0_i32_0 = arith.constant 0 : i32
    return %arg0, %c0_i32 : i32, i32
  }
  func.func @transform_1(%arg0: i32) -> (i32, i32) {
    %c0_i32 = arith.constant 0 : i32
    %c0_i32_0 = arith.constant 0 : i32
    %c0_i32_1 = arith.constant 0 : i32
    return %c0_i32, %c0_i32_0 : i32, i32
  }
  func.func @transform_2(%arg0: i32) -> (i32, i32) {
    %c0_i32 = arith.constant 0 : i32
    %c0_i32_0 = arith.constant 0 : i32
    %c0_i32_1 = arith.constant 0 : i32
    return %c0_i32, %c0_i32_0 : i32, i32
  }
  func.func @transform_3(%arg0: i32) -> (i32, i32) {
    %c0_i32 = arith.constant 0 : i32
    %c0_i32_0 = arith.constant 0 : i32
    %c0_i32_1 = arith.constant 0 : i32
    return %c0_i32, %c0_i32_0 : i32, i32
  }
  func.func @transform_4(%arg0: i32) -> (i32, i32) {
    %c0_i32 = arith.constant 0 : i32
    %c0_i32_0 = arith.constant 0 : i32
    %c0_i32_1 = arith.constant 0 : i32
    return %c0_i32, %c0_i32_0 : i32, i32
  }
  func.func @transform_5(%arg0: i32) -> (i32, i32) {
    %c0_i32 = arith.constant 0 : i32
    %c0_i32_0 = arith.constant 0 : i32
    %c0_i32_1 = arith.constant 0 : i32
    return %c0_i32, %c0_i32_0 : i32, i32
  }
  func.func @transform_6(%arg0: i32) -> (i32, i32) {
    %c0_i32 = arith.constant 0 : i32
    %c0_i32_0 = arith.constant 0 : i32
    %c0_i32_1 = arith.constant 0 : i32
    return %c0_i32, %c0_i32_0 : i32, i32
  }
  func.func @transform_7(%arg0: i32) -> (i32, i32) {
    %c0_i32 = arith.constant 0 : i32
    %c0_i32_0 = arith.constant 0 : i32
    %c0_i32_1 = arith.constant 0 : i32
    return %c0_i32, %c0_i32_0 : i32, i32
  }
  func.func @transform_8(%arg0: i32) -> (i32, i32) {
    %c0_i32 = arith.constant 0 : i32
    %c0_i32_0 = arith.constant 0 : i32
    return %arg0, %c0_i32 : i32, i32
  }
}

</mosaic_0001>

<bundles_post_ra>
// kernel: tile.17
= control target key start
LH: loop header
LB: loop body
LE: loop exit
PB: predicated region body
PF: predicated region fallthrough
CT: control target
= control target key end

     0   :  { %s76_s0 = inlined_call_operand.vmem [shape: f32[2,4,256], index: 0, kind: input, shape index: {}]   ;;  %s77_s1 = inlined_call_operand.vmem [shape: f32[8,256], index: 1, kind: output, shape index: {}]  }
   0x1   :  { %v36_v0 = vld [vmem:[%s76_s0 + $0xc] sm:$0xf]  ;;  %v37_v1 = vld [vmem:[%s76_s0 + $0x8] sm:$0xf]  ;;  %v38_v2 = vld [vmem:[%s76_s0 + $0x4] sm:$0xf] }
   0x2   :  { %8 = vst [vmem:[#allocation0 + $0x18] sm:$0xf] %v36_v0  ;;  %13 = vst [vmem:[#allocation0 + $0x10] sm:$0xf] %v37_v1  ;;  %v18_v3 = vld [vmem:[%s76_s0] sm:$0xf] }
   0x3   :  { %17 = vst [vmem:[#allocation0 + $0x8] sm:$0xf] %v38_v2  ;;  %19 = vst [vmem:[#allocation0] sm:$0xf] %v18_v3 }
   0x9   :  { %v27_v5 = vld [vmem:[#allocation0 + $0x10] sm:$0xf]   ;;  %v31_v6 = vld [vmem:[#allocation0 + $0x18] sm:$0xf]  }
   0xa   :  { %v23_v4 = vld [vmem:[#allocation0 + $0x8] sm:$0xf]   ;;  %v20_v7 = vld [vmem:[#allocation0] sm:$0xf]   ;;  %40 = vst [vmem:[%s77_s1 + $0x4] sm:$0xf] %v27_v5  }
   0xb   :  { %39 = vst [vmem:[%s77_s1 + $0x8] sm:$0xf] %v23_v4   ;;  %41 = vst [vmem:[%s77_s1 + $0xc] sm:$0xf] %v31_v6  }
   0xc   :  { %21 = vst [vmem:[%s77_s1] sm:$0xf] %v20_v7  }

// kernel: _lfm_forward_jit.1
= control target key start
LH: loop header
LB: loop body
LE: loop exit
PB: predicated region body
PF: predicated region fallthrough
CT: control target
= control target key end

     0   :  { %13 = vsyncpa [#allocation3], 0  ;;  %s1824_s0 = inlined_call_operand.vmem [shape: f32[8,256], index: 0, kind: input, shape index: {}]   ;;  %s1825_s1 = inlined_call_operand.vmem [shape: bf16[256,512], index: 1, kind: input, shape index: {}]   ;;  %s1826_s2 = inlined_call_operand.hbm [shape: bf16[256,256], index: 2, kind: input, shape index: {}]   ;;  %s1827_s3 = inlined_call_operand.hbm [shape: bf16[256,256], index: 3, kind: input, shape index: {}]   ;;  %s1828_s4 = inlined_call_operand.vmem [shape: bf16[16,16], index: 4, kind: input, shape index: {}]   ;;  %s1829_s5 = inlined_call_operand.vmem [shape: f32[16,256], index: 5, kind: input, shape index: {}]   ;;  %s1830_s6 = inlined_call_operand.vmem [shape: bf16[16,16], index: 6, kind: input, shape index: {}]   ;;  %s1831_s7 = inlined_call_operand.vmem [shape: f32[8,256], index: 7, kind: input, shape index: {}]   ;;  %s1832_s8 = inlined_call_operand.vmem [shape: f32[8,256], index: 8, kind: output, shape index: {}]  }
   0x1   :  { %14 = vsyncpa [#allocation5], 0  ;;  %s1510_s27 = smov [#allocation2]   ;;  %s1462_s9 = scalar_lea.hbm %s1826_s2, 4096 }
   0x2   :  { %s24_s28 = sshll.u32 %s1510_s27, 4  ;;  %p1463_p0 = scmp.ne.s32.totalorder %s1826_s2, %s1462_s9  ;;  %s25_s28 = int_to_ptr.vmem [resolvable:$true] %s24_s28 }
   0x3   :  { %p1466_p1 = scmp.lt.u32.totalorder %s1462_s9, %s1826_s2 }
   0x5   :  { %p1468_p2 = pnand %p1466_p1, %p1463_p0 }
   0x7   :  { %1471 = shalt.err (!%p1468_p2)
}
   0x8   :  { %s1472_s14 = scalar_lea.vmem %s25_s28, 4096  ;;  %p1477_p4 = scmp.lt.s32.totalorder %s25_s28, %s25_s28 }
   0x9   :  { %p1473_p3 = scmp.ne.s32.totalorder %s25_s28, %s1472_s14  ;;  %p1478_p5 = scmp.lt.s32.totalorder %s1472_s14, %s1472_s14 }
   0xb   :  { %p1479_p6 = por %p1478_p5, %p1477_p4 }
   0xd   :  { %p1480_p7 = pnand %p1479_p6, %p1473_p3 }
   0xf   :  { %1483 = shalt.err (!%p1480_p7)
}
  0x10   :  { %s1511_s15 = smov 128   ;;  %s1512_s16 = smov 8  }
  0x11   :  { %30 = dma.hbm_to_vmem [thread:$0]  %s1826_s2, 4096, %s25_s28, [#allocation3], %s1511_s15, %s1511_s15, %s1512_s16  }
  0x12   :  { %s1513_s19 = smov [#allocation4]   ;;  %s1484_s23 = scalar_lea.hbm %s1827_s3, 4096 }
  0x13   :  { %s36_s20 = sshll.u32 %s1513_s19, 4  ;;  %p1485_p8 = scmp.ne.s32.totalorder %s1827_s3, %s1484_s23  ;;  %s37_s20 = int_to_ptr.vmem [resolvable:$true] %s36_s20 }
  0x14   :  { %p1488_p9 = scmp.lt.u32.totalorder %s1484_s23, %s1827_s3 }
  0x16   :  { %p1490_p10 = pnand %p1488_p9, %p1485_p8 }
  0x18   :  { %1493 = shalt.err (!%p1490_p10)
}
  0x19   :  { %s1494_s29 = scalar_lea.vmem %s37_s20, 4096  ;;  %p1499_p12 = scmp.lt.s32.totalorder %s37_s20, %s37_s20 }
  0x1a   :  { %p1495_p11 = scmp.ne.s32.totalorder %s37_s20, %s1494_s29  ;;  %p1500_p13 = scmp.lt.s32.totalorder %s1494_s29, %s1494_s29 }
  0x1c   :  { %p1501_p0 = por %p1500_p13, %p1499_p12 }
  0x1e   :  { %p1502_p1 = pnand %p1501_p0, %p1495_p11 }
  0x20   :  { %1505 = shalt.err (!%p1502_p1)
}
  0x21   :  { %42 = dma.hbm_to_vmem [thread:$0]  %s1827_s3, 4096, %s37_s20, [#allocation5], %s1511_s15, %s1511_s15, %s1512_s16  }
  0x22   :  { %1506 = dma.done.wait [#allocation3], 4096  }
  0x23   :  { %1507 = vsyncadd [#allocation3], 4294963200 }
  0x24   :  { %1508 = dma.done.wait [#allocation5], 4096  }
  0x25   :  { %1509 = vsyncadd [#allocation5], 4294963200  ;;  %v1268_v0 = vld [vmem:[%s1825_s1 + $0x4] ss:$16 sps:$4 sm:$0xff]   ;;  %v1270_v1 = vld [vmem:[%s1825_s1 + $0xc] ss:$16 sps:$4 sm:$0xff]  }
  0x26   :  { %446 = vmatprep.subr.bf16.mxu0 %v1268_v0  ;;  %v1272_v2 = vld [vmem:[%s1825_s1] ss:$16 sps:$4 sm:$0xff]   ;;  %v1273_v3 = vld [vmem:[%s1825_s1 + $0x8] ss:$16 sps:$4 sm:$0xff]   ;;  %487 = vmatprep.subr.bf16.mxu1 %v1270_v1  ;;  %v1274_v4 = vld [vmem:[%s1825_s1 + $0x24] ss:$16 sps:$4 sm:$0xff]  }
  0x27   :  { %447 = vmatpush1.bf16.msra.mxu0 %v1272_v2  ;;  %488 = vmatpush1.bf16.msra.mxu1 %v1273_v3  ;;  %v1276_v5 = vld [vmem:[%s1825_s1 + $0x2c] ss:$16 sps:$4 sm:$0xff]   ;;  %v1278_v6 = vld [vmem:[%s1825_s1 + $0x20] ss:$16 sps:$4 sm:$0xff]   ;;  %v1279_v7 = vld [vmem:[%s1825_s1 + $0x28] ss:$16 sps:$4 sm:$0xff]  }
  0x28   :  { %448 = vmatprep.subr.bf16.mxu0 %v1274_v4  ;;  %489 = vmatprep.subr.bf16.mxu1 %v1276_v5  ;;  %v1280_v8 = vld [vmem:[%s1825_s1 + $0x44] ss:$16 sps:$4 sm:$0xff]   ;;  %v1282_v9 = vld [vmem:[%s1825_s1 + $0x4c] ss:$16 sps:$4 sm:$0xff]   ;;  %v1284_v10 = vld [vmem:[%s1825_s1 + $0x40] ss:$16 sps:$4 sm:$0xff]  }
  0x29   :  { %v1285_v11 = vld [vmem:[%s1825_s1 + $0x48] ss:$16 sps:$4 sm:$0xff]   ;;  %v1286_v12 = vld [vmem:[%s1825_s1 + $0x64] ss:$16 sps:$4 sm:$0xff]   ;;  %v1288_v13 = vld [vmem:[%s1825_s1 + $0x6c] ss:$16 sps:$4 sm:$0xff]  }
  0x2a   :  { %v1290_v14 = vld [vmem:[%s1825_s1 + $0x60] ss:$16 sps:$4 sm:$0xff]   ;;  %v1291_v15 = vld [vmem:[%s1825_s1 + $0x68] ss:$16 sps:$4 sm:$0xff]   ;;  %v1292_v16 = vld [vmem:[%s1825_s1 + $0x84] ss:$16 sps:$4 sm:$0xff]  }
  0x2b   :  { %449 = vmatpush1.bf16.msra.mxu0 %v1278_v6  ;;  %490 = vmatpush1.bf16.msra.mxu1 %v1279_v7  ;;  %v1294_v17 = vld [vmem:[%s1825_s1 + $0x8c] ss:$16 sps:$4 sm:$0xff]   ;;  %v1296_v18 = vld [vmem:[%s1825_s1 + $0x80] ss:$16 sps:$4 sm:$0xff]   ;;  %v1297_v19 = vld [vmem:[%s1825_s1 + $0x88] ss:$16 sps:$4 sm:$0xff]  }
  0x2c   :  { %450 = vmatprep.subr.bf16.mxu0 %v1280_v8  ;;  %491 = vmatprep.subr.bf16.mxu1 %v1282_v9  ;;  %v1298_v20 = vld [vmem:[%s1825_s1 + $0xa4] ss:$16 sps:$4 sm:$0xff]   ;;  %v1300_v21 = vld [vmem:[%s1825_s1 + $0xac] ss:$16 sps:$4 sm:$0xff]   ;;  %v1302_v22 = vld [vmem:[%s1825_s1 + $0xa0] ss:$16 sps:$4 sm:$0xff]  }
  0x2d   :  { %v1303_v23 = vld [vmem:[%s1825_s1 + $0xa8] ss:$16 sps:$4 sm:$0xff]   ;;  %v1304_v24 = vld [vmem:[%s1825_s1 + $0xc4] ss:$16 sps:$4 sm:$0xff]   ;;  %v1306_v25 = vld [vmem:[%s1825_s1 + $0xcc] ss:$16 sps:$4 sm:$0xff]  }
  0x2e   :  { %v1308_v26 = vld [vmem:[%s1825_s1 + $0xc0] ss:$16 sps:$4 sm:$0xff]   ;;  %v1309_v27 = vld [vmem:[%s1825_s1 + $0xc8] ss:$16 sps:$4 sm:$0xff]   ;;  %v1310_v28 = vld [vmem:[%s1825_s1 + $0xe4] ss:$16 sps:$4 sm:$0xff]  }
  0x2f   :  { %451 = vmatpush1.bf16.msra.mxu0 %v1284_v10  ;;  %492 = vmatpush1.bf16.msra.mxu1 %v1285_v11  ;;  %v1312_v29 = vld [vmem:[%s1825_s1 + $0xec] ss:$16 sps:$4 sm:$0xff]   ;;  %v1314_v30 = vld [vmem:[%s1825_s1 + $0xe0] ss:$16 sps:$4 sm:$0xff]   ;;  %v1315_v31 = vld [vmem:[%s1825_s1 + $0xe8] ss:$16 sps:$4 sm:$0xff]  }
  0x30   :  { %452 = vmatprep.subr.bf16.mxu0 %v1286_v12  ;;  %493 = vmatprep.subr.bf16.mxu1 %v1288_v13  ;;  %v1316_v32 = vld [vmem:[%s1825_s1 + $0x104] ss:$16 sps:$4 sm:$0xff]   ;;  %v1318_v33 = vld [vmem:[%s1825_s1 + $0x10c] ss:$16 sps:$4 sm:$0xff]   ;;  %v1320_v34 = vld [vmem:[%s1825_s1 + $0x100] ss:$16 sps:$4 sm:$0xff]  }
  0x31   :  { %v1321_v35 = vld [vmem:[%s1825_s1 + $0x108] ss:$16 sps:$4 sm:$0xff]   ;;  %v1322_v36 = vld [vmem:[%s1825_s1 + $0x124] ss:$16 sps:$4 sm:$0xff]   ;;  %v1324_v37 = vld [vmem:[%s1825_s1 + $0x12c] ss:$16 sps:$4 sm:$0xff]  }
  0x32   :  { %v1326_v38 = vld [vmem:[%s1825_s1 + $0x120] ss:$16 sps:$4 sm:$0xff]   ;;  %v1327_v39 = vld [vmem:[%s1825_s1 + $0x128] ss:$16 sps:$4 sm:$0xff]   ;;  %v1328_v40 = vld [vmem:[%s1825_s1 + $0x144] ss:$16 sps:$4 sm:$0xff]  }
  0x33   :  { %453 = vmatpush1.bf16.msra.mxu0 %v1290_v14  ;;  %494 = vmatpush1.bf16.msra.mxu1 %v1291_v15  ;;  %v1330_v41 = vld [vmem:[%s1825_s1 + $0x14c] ss:$16 sps:$4 sm:$0xff]   ;;  %v1332_v42 = vld [vmem:[%s1825_s1 + $0x140] ss:$16 sps:$4 sm:$0xff]   ;;  %v1333_v43 = vld [vmem:[%s1825_s1 + $0x148] ss:$16 sps:$4 sm:$0xff]  }
  0x34   :  { %454 = vmatprep.subr.bf16.mxu0 %v1292_v16  ;;  %495 = vmatprep.subr.bf16.mxu1 %v1294_v17  ;;  %v1334_v44 = vld [vmem:[%s1825_s1 + $0x164] ss:$16 sps:$4 sm:$0xff]   ;;  %v1336_v45 = vld [vmem:[%s1825_s1 + $0x16c] ss:$16 sps:$4 sm:$0xff]   ;;  %v1338_v46 = vld [vmem:[%s1825_s1 + $0x160] ss:$16 sps:$4 sm:$0xff]  }
  0x35   :  { %v1339_v47 = vld [vmem:[%s1825_s1 + $0x168] ss:$16 sps:$4 sm:$0xff]   ;;  %v1340_v49 = vld [vmem:[%s1825_s1 + $0x184] ss:$16 sps:$4 sm:$0xff]   ;;  %v1342_v50 = vld [vmem:[%s1825_s1 + $0x18c] ss:$16 sps:$4 sm:$0xff]  }
  0x36   :  { %v1731_v48 = vld [vmem:[%s1824_s0 + $0x8] sm:$0xff]  ;;  %v1344_v52 = vld [vmem:[%s1825_s1 + $0x180] ss:$16 sps:$4 sm:$0xff]   ;;  %v1346_v54 = vld [vmem:[%s1825_s1 + $0x1a4] ss:$16 sps:$4 sm:$0xff]   ;;  %v1514_v4 = vmov 0  }
  0x37   :  { %455 = vmatpush1.bf16.msra.mxu0 %v1296_v18  ;;  %496 = vmatpush1.bf16.msra.mxu1 %v1297_v19  ;;  %v61_v51 = vpack.c.bf16 %v1731_v48, %v1731_v48  ;;  %v1345_v53 = vld [vmem:[%s1825_s1 + $0x188] ss:$16 sps:$4 sm:$0xff]   ;;  %v1348_v55 = vld [vmem:[%s1825_s1 + $0x1ac] ss:$16 sps:$4 sm:$0xff]   ;;  %v1350_v56 = vld [vmem:[%s1825_s1 + $0x1a0] ss:$16 sps:$4 sm:$0xff]  }
  0x38   :  { %456 = vmatprep.subr.bf16.mxu0 %v1298_v20  ;;  %497 = vmatprep.subr.bf16.mxu1 %v1300_v21  ;;  %v1351_v57 = vld [vmem:[%s1825_s1 + $0x1a8] ss:$16 sps:$4 sm:$0xff]   ;;  %v1352_v58 = vld [vmem:[%s1825_s1 + $0x1c4] ss:$16 sps:$4 sm:$0xff]   ;;  %v1354_v59 = vld [vmem:[%s1825_s1 + $0x1cc] ss:$16 sps:$4 sm:$0xff]  }
  0x39   :  { %478 = vmatprep.mubr.bf16.mxu0 %v61_v51  ;;  %519 = vmatprep.mubr.bf16.mxu1 %v61_v51  ;;  %v1356_v60 = vld [vmem:[%s1825_s1 + $0x1c0] ss:$16 sps:$4 sm:$0xff]   ;;  %v1357_v61 = vld [vmem:[%s1825_s1 + $0x1c8] ss:$16 sps:$4 sm:$0xff]   ;;  %v1358_v62 = vld [vmem:[%s1825_s1 + $0x1e4] ss:$16 sps:$4 sm:$0xff]  }
  0x3a   :  { %v1360_v63 = vld [vmem:[%s1825_s1 + $0x1ec] ss:$16 sps:$4 sm:$0xff]   ;;  %v1362_v0 = vld [vmem:[%s1825_s1 + $0x1e0] ss:$16 sps:$4 sm:$0xff]   ;;  %v1363_v1 = vld [vmem:[%s1825_s1 + $0x1e8] ss:$16 sps:$4 sm:$0xff]  }
  0x3b   :  { %457 = vmatpush1.bf16.msra.mxu0 %v1302_v22  ;;  %498 = vmatpush1.bf16.msra.mxu1 %v1303_v23  ;;  %v1786_v2 = vld [vmem:[%s1824_s0] sm:$0xff]  ;;  %vm541_vm0 = vcmask 130048   ;;  %v1375_v18 = vld [vmem:[#allocation4 + $0x10] ss:$8 sps:$4 sm:$0xff]   ;;  %v1377_v19 = vld [vmem:[#allocation4 + $0x14] ss:$8 sps:$4 sm:$0xff]  }
  0x3c   :  { %458 = vmatprep.subr.bf16.mxu0 %v1304_v24  ;;  %499 = vmatprep.subr.bf16.mxu1 %v1306_v25  ;;  %v60_v3 = vpack.c.bf16 %v1786_v2, %v1786_v2  ;;  %v1364_v15 = vld [vmem:[%s1828_s4] sm:$0xff]   ;;  %v1387_v22 = vld [vmem:[#allocation4 + $0x30] ss:$8 sps:$4 sm:$0xff]   ;;  %v1389_v23 = vld [vmem:[#allocation4 + $0x34] ss:$8 sps:$4 sm:$0xff]  }
  0x3d   :  { %v1369_v16 = vld [vmem:[#allocation4] ss:$8 sps:$4 sm:$0xff]   ;;  %v1371_v17 = vld [vmem:[#allocation4 + $0x4] ss:$8 sps:$4 sm:$0xff]  }
  0x3e   :  { %v1381_v20 = vld [vmem:[#allocation4 + $0x20] ss:$8 sps:$4 sm:$0xff]   ;;  %v1383_v21 = vld [vmem:[#allocation4 + $0x24] ss:$8 sps:$4 sm:$0xff]  }
  0x3f   :  { %459 = vmatpush1.bf16.msra.mxu0 %v1308_v26  ;;  %500 = vmatpush1.bf16.msra.mxu1 %v1309_v27  ;;  %v1393_v24 = vld [vmem:[#allocation4 + $0x40] ss:$8 sps:$4 sm:$0xff]   ;;  %v1395_v25 = vld [vmem:[#allocation4 + $0x44] ss:$8 sps:$4 sm:$0xff]   ;;  %v1399_v26 = vld [vmem:[#allocation4 + $0x50] ss:$8 sps:$4 sm:$0xff]  }
  0x40   :  { %460 = vmatprep.subr.bf16.mxu0 %v1310_v28  ;;  %501 = vmatprep.subr.bf16.mxu1 %v1312_v29  ;;  %v1401_v27 = vld [vmem:[#allocation4 + $0x54] ss:$8 sps:$4 sm:$0xff]   ;;  %v1405_v28 = vld [vmem:[#allocation4 + $0x60] ss:$8 sps:$4 sm:$0xff]   ;;  %v1407_v29 = vld [vmem:[#allocation4 + $0x64] ss:$8 sps:$4 sm:$0xff]  }
  0x43   :  { %461 = vmatpush1.bf16.msra.mxu0 %v1314_v30  ;;  %502 = vmatpush1.bf16.msra.mxu1 %v1315_v31  ;;  %v1411_v30 = vld [vmem:[#allocation4 + $0x70] ss:$8 sps:$4 sm:$0xff]   ;;  %v1413_v31 = vld [vmem:[#allocation4 + $0x74] ss:$8 sps:$4 sm:$0xff]  }
  0x44   :  { %462 = vmatprep.subr.bf16.mxu0 %v1316_v32  ;;  %503 = vmatprep.subr.bf16.mxu1 %v1318_v33  ;;  %v1417_v32 = vld [vmem:[#allocation4 + $0x80] ss:$8 sps:$4 sm:$0xff]   ;;  %v1419_v33 = vld [vmem:[#allocation4 + $0x84] ss:$8 sps:$4 sm:$0xff]  }
  0x47   :  { %463 = vmatpush1.bf16.msra.mxu0 %v1320_v34  ;;  %504 = vmatpush1.bf16.msra.mxu1 %v1321_v35  ;;  %v1423_v34 = vld [vmem:[#allocation4 + $0x90] ss:$8 sps:$4 sm:$0xff]   ;;  %v1425_v35 = vld [vmem:[#allocation4 + $0x94] ss:$8 sps:$4 sm:$0xff]  }
  0x48   :  { %464 = vmatprep.subr.bf16.mxu0 %v1322_v36  ;;  %505 = vmatprep.subr.bf16.mxu1 %v1324_v37  ;;  %v1429_v36 = vld [vmem:[#allocation4 + $0xa0] ss:$8 sps:$4 sm:$0xff]   ;;  %v1431_v37 = vld [vmem:[#allocation4 + $0xa4] ss:$8 sps:$4 sm:$0xff]  }
  0x4b   :  { %465 = vmatpush1.bf16.msra.mxu0 %v1326_v38  ;;  %506 = vmatpush1.bf16.msra.mxu1 %v1327_v39  ;;  %v1435_v38 = vld [vmem:[#allocation4 + $0xb0] ss:$8 sps:$4 sm:$0xff]   ;;  %v1437_v39 = vld [vmem:[#allocation4 + $0xb4] ss:$8 sps:$4 sm:$0xff]  }
  0x4c   :  { %466 = vmatprep.subr.bf16.mxu0 %v1328_v40  ;;  %507 = vmatprep.subr.bf16.mxu1 %v1330_v41  ;;  %v1441_v40 = vld [vmem:[#allocation4 + $0xc0] ss:$8 sps:$4 sm:$0xff]   ;;  %v1443_v41 = vld [vmem:[#allocation4 + $0xc4] ss:$8 sps:$4 sm:$0xff]  }
  0x4f   :  { %467 = vmatpush1.bf16.msra.mxu0 %v1332_v42  ;;  %508 = vmatpush1.bf16.msra.mxu1 %v1333_v43  ;;  %v1447_v42 = vld [vmem:[#allocation4 + $0xd0] ss:$8 sps:$4 sm:$0xff]   ;;  %v1449_v43 = vld [vmem:[#allocation4 + $0xd4] ss:$8 sps:$4 sm:$0xff]  }
  0x50   :  { %468 = vmatprep.subr.bf16.mxu0 %v1334_v44  ;;  %509 = vmatprep.subr.bf16.mxu1 %v1336_v45  ;;  %v1453_v44 = vld [vmem:[#allocation4 + $0xe0] ss:$8 sps:$4 sm:$0xff]   ;;  %v1455_v45 = vld [vmem:[#allocation4 + $0xe4] ss:$8 sps:$4 sm:$0xff]  }
  0x53   :  { %469 = vmatpush1.bf16.msra.mxu0 %v1338_v46  ;;  %510 = vmatpush1.bf16.msra.mxu1 %v1339_v47  ;;  %v532_v46 = vld [vmem:[%s1829_s5] sm:$0xff]  ;;  %v533_v47 = vld [vmem:[%s1829_s5 + $0x8] sm:$0xff] }
  0x54   :  { %470 = vmatprep.subr.bf16.mxu0 %v1340_v49  ;;  %511 = vmatprep.subr.bf16.mxu1 %v1342_v50  ;;  %v534_v50 = vld [vmem:[%s1829_s5 + $0x10] sm:$0xff] }
  0x57   :  { %471 = vmatpush1.bf16.msra.mxu0 %v1344_v52  ;;  %512 = vmatpush1.bf16.msra.mxu1 %v1345_v53  ;;  %v535_v53 = vld [vmem:[%s1829_s5 + $0x18] sm:$0xff] }
  0x58   :  { %472 = vmatprep.subr.bf16.mxu0 %v1346_v54  ;;  %513 = vmatprep.subr.bf16.mxu1 %v1348_v55 }
  0x5b   :  { %473 = vmatpush1.bf16.msra.mxu0 %v1350_v56  ;;  %514 = vmatpush1.bf16.msra.mxu1 %v1351_v57 }
  0x5c   :  { %474 = vmatprep.subr.bf16.mxu0 %v1352_v58  ;;  %515 = vmatprep.subr.bf16.mxu1 %v1354_v59 }
  0x5f   :  { %475 = vmatpush1.bf16.msra.mxu0 %v1356_v60  ;;  %516 = vmatpush1.bf16.msra.mxu1 %v1357_v61 }
  0x60   :  { %476 = vmatprep.subr.bf16.mxu0 %v1358_v62  ;;  %517 = vmatprep.subr.bf16.mxu1 %v1360_v63 }
  0x63   :  { %477 = vmatpush1.bf16.msra.mxu0 %v1362_v0  ;;  %518 = vmatpush1.bf16.msra.mxu1 %v1363_v1  ;;  %v1368_v1 = vld [vmem:[#allocation2 + $0x4] ss:$8 sps:$4 sm:$0xff]  }
  0x66   :  { %479 = vmatmul.mubr.bf16.vlgmr.msra.gmra.mrb[0].mxu0 %v60_v3  ;;  %520 = vmatmul.mubr.bf16.vlgmr.msra.gmra.mrb[0].mxu1 %v60_v3  ;;  %v1365_v3 = vld [vmem:[%s1830_s6] sm:$0xff]  }
  0x67   :  { %577 = vmatprep.mubr.bf16.mxu0 %v1514_v4  ;;  %636 = vmatprep.mubr.bf16.mxu1 %v1514_v4  ;;  %v1366_v4 = vld [vmem:[#allocation2] ss:$8 sps:$4 sm:$0xff]  }
 0x139   :  { %v480_v5 = vpop.f32.mrb[0].mxu0  ;;  %v521_v6 = vpop.f32.mrb[0].mxu1 }
 0x13a   :  { %v528_v7 = vpack.c.bf16 %v521_v6, %v480_v5  ;;  %v482_v8 = vpop.f32.mrb[1].mxu0  ;;  %v523_v9 = vpop.f32.mrb[1].mxu1  ;;  %v1374_v5 = vld [vmem:[#allocation2 + $0x14] ss:$8 sps:$4 sm:$0xff]   ;;  %v1372_v6 = vld [vmem:[#allocation2 + $0x10] ss:$8 sps:$4 sm:$0xff]  }
 0x13b   :  { %v529_v10 = vpack.c.bf16 %v523_v9, %v482_v8  ;;  %v484_v11 = vpop.f32.mrb[2].mxu0  ;;  %v525_v12 = vpop.f32.mrb[2].mxu1  ;;  %v1378_v8 = vld [vmem:[#allocation2 + $0x20] ss:$8 sps:$4 sm:$0xff]   ;;  %v1386_v9 = vld [vmem:[#allocation2 + $0x34] ss:$8 sps:$4 sm:$0xff]  }
 0x13c   :  { %v485_v13 = vpop.f32.mrb[3].mxu0  ;;  %v526_v14 = vpop.f32.mrb[3].mxu1  ;;  %v1392_v11 = vld [vmem:[#allocation2 + $0x44] ss:$8 sps:$4 sm:$0xff]   ;;  %v1390_v12 = vld [vmem:[#allocation2 + $0x40] ss:$8 sps:$4 sm:$0xff]  }
 0x13d   :  { %545 = vmatprep.subr.bf16.mxu0 %v529_v10  ;;  %v1384_v10 = vld [vmem:[#allocation2 + $0x30] ss:$8 sps:$4 sm:$0xff]   ;;  %v1398_v13 = vld [vmem:[#allocation2 + $0x54] ss:$8 sps:$4 sm:$0xff]  }
 0x13e   :  { %546 = vmatpush1.bf16.msra.mxu0 %v528_v7  ;;  %v1380_v7 = vld [vmem:[#allocation2 + $0x24] ss:$8 sps:$4 sm:$0xff]   ;;  %v1396_v14 = vld [vmem:[#allocation2 + $0x50] ss:$8 sps:$4 sm:$0xff]  }
 0x13f   :  { %875 = vmatprep.subr.bf16.mxu0 %v1371_v17  ;;  %v1410_v17 = vld [vmem:[#allocation2 + $0x74] ss:$8 sps:$4 sm:$0xff]  }
 0x141   :  { %1196 = vmatmul.mubr.msk.bf16.vlgmr.msra.gmra.mrb[4].mxu0 %vm541_vm0, %v1364_v15  ;;  %v1404_v15 = vld [vmem:[#allocation2 + $0x64] ss:$8 sps:$4 sm:$0xff]  }
 0x142   :  { %876 = vmatpush1.bf16.msra.mxu0 %v1369_v16  ;;  %v1402_v16 = vld [vmem:[#allocation2 + $0x60] ss:$8 sps:$4 sm:$0xff]  }
 0x143   :  { %877 = vmatprep.subr.bf16.mxu0 %v1377_v19  ;;  %v1416_v19 = vld [vmem:[#allocation2 + $0x84] ss:$8 sps:$4 sm:$0xff]  }
 0x146   :  { %878 = vmatpush1.bf16.msra.mxu0 %v1375_v18  ;;  %v1408_v18 = vld [vmem:[#allocation2 + $0x70] ss:$8 sps:$4 sm:$0xff]  }
 0x147   :  { %879 = vmatprep.subr.bf16.mxu0 %v1383_v21  ;;  %v1422_v21 = vld [vmem:[#allocation2 + $0x94] ss:$8 sps:$4 sm:$0xff]  }
 0x14a   :  { %880 = vmatpush1.bf16.msra.mxu0 %v1381_v20  ;;  %v1414_v20 = vld [vmem:[#allocation2 + $0x80] ss:$8 sps:$4 sm:$0xff]  }
 0x14b   :  { %881 = vmatprep.subr.bf16.mxu0 %v1389_v23  ;;  %v1428_v23 = vld [vmem:[#allocation2 + $0xa4] ss:$8 sps:$4 sm:$0xff]  }
 0x14e   :  { %882 = vmatpush1.bf16.msra.mxu0 %v1387_v22  ;;  %v1420_v22 = vld [vmem:[#allocation2 + $0x90] ss:$8 sps:$4 sm:$0xff]  }
 0x14f   :  { %883 = vmatprep.subr.bf16.mxu0 %v1395_v25  ;;  %v1434_v25 = vld [vmem:[#allocation2 + $0xb4] ss:$8 sps:$4 sm:$0xff]  }
 0x152   :  { %884 = vmatpush1.bf16.msra.mxu0 %v1393_v24  ;;  %v1426_v24 = vld [vmem:[#allocation2 + $0xa0] ss:$8 sps:$4 sm:$0xff]  }
 0x153   :  { %885 = vmatprep.subr.bf16.mxu0 %v1401_v27  ;;  %v1440_v27 = vld [vmem:[#allocation2 + $0xc4] ss:$8 sps:$4 sm:$0xff]  }
 0x156   :  { %886 = vmatpush1.bf16.msra.mxu0 %v1399_v26  ;;  %v1432_v26 = vld [vmem:[#allocation2 + $0xb0] ss:$8 sps:$4 sm:$0xff]  }
 0x157   :  { %887 = vmatprep.subr.bf16.mxu0 %v1407_v29  ;;  %v1446_v29 = vld [vmem:[#allocation2 + $0xd4] ss:$8 sps:$4 sm:$0xff]  }
 0x15a   :  { %888 = vmatpush1.bf16.msra.mxu0 %v1405_v28  ;;  %v1438_v28 = vld [vmem:[#allocation2 + $0xc0] ss:$8 sps:$4 sm:$0xff]  }
 0x15b   :  { %889 = vmatprep.subr.bf16.mxu0 %v1413_v31  ;;  %v1452_v31 = vld [vmem:[#allocation2 + $0xe4] ss:$8 sps:$4 sm:$0xff]  }
 0x15e   :  { %890 = vmatpush1.bf16.msra.mxu0 %v1411_v30  ;;  %v1444_v30 = vld [vmem:[#allocation2 + $0xd0] ss:$8 sps:$4 sm:$0xff]  }
 0x15f   :  { %891 = vmatprep.subr.bf16.mxu0 %v1419_v33  ;;  %v1458_v33 = vld [vmem:[#allocation2 + $0xf4] ss:$8 sps:$4 sm:$0xff]  }
 0x162   :  { %892 = vmatpush1.bf16.msra.mxu0 %v1417_v32  ;;  %v1450_v32 = vld [vmem:[#allocation2 + $0xe0] ss:$8 sps:$4 sm:$0xff]  }
 0x163   :  { %893 = vmatprep.subr.bf16.mxu0 %v1425_v35  ;;  %v1461_v35 = vld [vmem:[#allocation4 + $0xf4] ss:$8 sps:$4 sm:$0xff]  }
 0x166   :  { %894 = vmatpush1.bf16.msra.mxu0 %v1423_v34  ;;  %v1456_v34 = vld [vmem:[#allocation2 + $0xf0] ss:$8 sps:$4 sm:$0xff]  }
 0x167   :  { %895 = vmatprep.subr.bf16.mxu0 %v1431_v37 }
 0x16a   :  { %896 = vmatpush1.bf16.msra.mxu0 %v1429_v36  ;;  %v1459_v36 = vld [vmem:[#allocation4 + $0xf0] ss:$8 sps:$4 sm:$0xff]  }
 0x16b   :  { %897 = vmatprep.subr.bf16.mxu0 %v1437_v39 }
 0x16e   :  { %898 = vmatpush1.bf16.msra.mxu0 %v1435_v38 }
 0x16f   :  { %899 = vmatprep.subr.bf16.mxu0 %v1443_v41 }
 0x172   :  { %900 = vmatpush1.bf16.msra.mxu0 %v1441_v40 }
 0x173   :  { %901 = vmatprep.subr.bf16.mxu0 %v1449_v43 }
 0x176   :  { %902 = vmatpush1.bf16.msra.mxu0 %v1447_v42 }
 0x177   :  { %903 = vmatprep.subr.bf16.mxu0 %v1455_v45 }
 0x17a   :  { %904 = vmatpush1.bf16.msra.mxu0 %v1453_v44 }
 0x17b   :  { %905 = vmatprep.subr.bf16.mxu0 %v1461_v35 }
 0x17e   :  { %906 = vmatpush1.bf16.msra.mxu0 %v1459_v36 }
 0x214   :  { %v579_v49 = vpop.f32.mrb[4].mxu0 }
 0x215   :  { %v580_v51 = vadd.f32 %v579_v49, %v532_v46  ;;  %v581_v52 = vpop.f32.mrb[5].mxu0 }
 0x216   :  { %v582_v54 = vadd.f32 %v581_v52, %v533_v47  ;;  %v583_v55 = vpop.f32.mrb[6].mxu0 }
 0x217   :  { %v584_v56 = vadd.f32 %v583_v55, %v534_v50  ;;  %v585_v57 = vpop.f32.mrb[7].mxu0  ;;  %v588_v59 = vmax.f32 %v580_v51, 0.0 }
 0x218   :  { %v586_v58 = vadd.f32 %v585_v57, %v535_v53  ;;  %v589_v61 = vmax.f32 %v582_v54, 0.0  ;;  %v1119_v53 = vld [vmem:[%s1831_s7] sm:$0xff]  ;;  %v1120_v57 = vld [vmem:[%s1831_s7 + $0x8] sm:$0xff] }
 0x219   :  { %v590_v60 = vmax.f32 %v584_v56, 0.0 }
 0x21a   :  { %v591_v62 = vmax.f32 %v586_v58, 0.0 }
 0x21b   :  { %v594_v63 = vpack.c.bf16 %v590_v60, %v588_v59 }
 0x21c   :  { %v595_v0 = vpack.c.bf16 %v591_v62, %v589_v61 }
 0x21e   :  { %604 = vmatprep.subr.bf16.mxu1 %v595_v0 }
 0x21f   :  { %605 = vmatpush1.bf16.msra.mxu1 %v594_v63 }
 0x220   :  { %1076 = vmatprep.subr.bf16.mxu1 %v1368_v1 }
 0x222   :  { %1198 = vmatmul.mubr.msk.bf16.vlgmr.msra.gmra.mrb[4].mxu1 %vm541_vm0, %v1365_v3 }
 0x223   :  { %1077 = vmatpush1.bf16.msra.mxu1 %v1366_v4 }
 0x224   :  { %1078 = vmatprep.subr.bf16.mxu1 %v1374_v5 }
 0x227   :  { %1079 = vmatpush1.bf16.msra.mxu1 %v1372_v6 }
 0x228   :  { %1080 = vmatprep.subr.bf16.mxu1 %v1380_v7 }
 0x22b   :  { %1081 = vmatpush1.bf16.msra.mxu1 %v1378_v8 }
 0x22c   :  { %1082 = vmatprep.subr.bf16.mxu1 %v1386_v9 }
 0x22f   :  { %1083 = vmatpush1.bf16.msra.mxu1 %v1384_v10 }
 0x230   :  { %1084 = vmatprep.subr.bf16.mxu1 %v1392_v11 }
 0x233   :  { %1085 = vmatpush1.bf16.msra.mxu1 %v1390_v12 }
 0x234   :  { %1086 = vmatprep.subr.bf16.mxu1 %v1398_v13 }
 0x237   :  { %1087 = vmatpush1.bf16.msra.mxu1 %v1396_v14 }
 0x238   :  { %1088 = vmatprep.subr.bf16.mxu1 %v1404_v15 }
 0x23b   :  { %1089 = vmatpush1.bf16.msra.mxu1 %v1402_v16 }
 0x23c   :  { %1090 = vmatprep.subr.bf16.mxu1 %v1410_v17 }
 0x23f   :  { %1091 = vmatpush1.bf16.msra.mxu1 %v1408_v18 }
 0x240   :  { %1092 = vmatprep.subr.bf16.mxu1 %v1416_v19 }
 0x243   :  { %1093 = vmatpush1.bf16.msra.mxu1 %v1414_v20 }
 0x244   :  { %1094 = vmatprep.subr.bf16.mxu1 %v1422_v21 }
 0x247   :  { %1095 = vmatpush1.bf16.msra.mxu1 %v1420_v22 }
 0x248   :  { %1096 = vmatprep.subr.bf16.mxu1 %v1428_v23 }
 0x24b   :  { %1097 = vmatpush1.bf16.msra.mxu1 %v1426_v24 }
 0x24c   :  { %1098 = vmatprep.subr.bf16.mxu1 %v1434_v25 }
 0x24f   :  { %1099 = vmatpush1.bf16.msra.mxu1 %v1432_v26 }
 0x250   :  { %1100 = vmatprep.subr.bf16.mxu1 %v1440_v27 }
 0x253   :  { %1101 = vmatpush1.bf16.msra.mxu1 %v1438_v28 }
 0x254   :  { %1102 = vmatprep.subr.bf16.mxu1 %v1446_v29 }
 0x257   :  { %1103 = vmatpush1.bf16.msra.mxu1 %v1444_v30 }
 0x258   :  { %1104 = vmatprep.subr.bf16.mxu1 %v1452_v31 }
 0x25b   :  { %1105 = vmatpush1.bf16.msra.mxu1 %v1450_v32 }
 0x25c   :  { %1106 = vmatprep.subr.bf16.mxu1 %v1458_v33 }
 0x25f   :  { %1107 = vmatpush1.bf16.msra.mxu1 %v1456_v34 }
 0x2f5   :  { %v638_v37 = vpop.f32.mrb[4].mxu1 }
 0x2f6   :  { %v640_v38 = vpop.f32.mrb[5].mxu1  ;;  %v647_v41 = vpack.c.bf16 %v638_v37, %v638_v37 }
 0x2f7   :  { %v648_v39 = vpack.c.bf16 %v640_v38, %v640_v38  ;;  %v642_v40 = vpop.f32.mrb[6].mxu1 }
 0x2f8   :  { %v644_v42 = vpop.f32.mrb[7].mxu1  ;;  %v649_v44 = vpack.c.bf16 %v642_v40, %v642_v40 }
 0x2f9   :  { %v650_v43 = vpack.c.bf16 %v644_v42, %v644_v42  ;;  %1108 = vmatprep.mubr.bf16.mxu1 %v648_v39 }
 0x2fa   :  { %1109 = vmatmul.mubr.bf16.vlgmr.msra.gmra.mrb[8].mxu1 %v647_v41 }
 0x2fb   :  { %907 = vmatprep.mubr.bf16.mxu0 %v650_v43 }
 0x2fc   :  { %908 = vmatmul.mubr.bf16.vlgmr.msra.gmra.mrb[8].mxu0 %v649_v44 }
 0x3cd   :  { %v1110_v45 = vpop.f32.mrb[8].mxu1 }
 0x3ce   :  { %v1112_v46 = vpop.f32.mrb[9].mxu1 }
 0x3cf   :  { %v909_v47 = vpop.f32.mrb[8].mxu0  ;;  %v1114_v49 = vpop.f32.mrb[10].mxu1 }
 0x3d0   :  { %v1111_v50 = vadd.f32 %v1110_v45, %v909_v47  ;;  %v911_v51 = vpop.f32.mrb[9].mxu0  ;;  %v1115_v52 = vpop.f32.mrb[11].mxu1 }
 0x3d1   :  { %v1113_v54 = vadd.f32 %v1112_v46, %v911_v51  ;;  %v913_v55 = vpop.f32.mrb[10].mxu0 }
 0x3d2   :  { %v1117_v56 = vadd.f32 %v1111_v50, %v1786_v2  ;;  %v914_v58 = vpop.f32.mrb[11].mxu0 }
 0x3d3   :  { %v1118_v59 = vadd.f32 %v1113_v54, %v1731_v48 }
 0x3d4   :  { %v1121_v60 = vadd.f32 %v1119_v53, %v1117_v56 }
 0x3d5   :  { %v1122_v61 = vadd.f32 %v1120_v57, %v1118_v59 }
 0x3d6   :  { %1123 = vst [vmem:[%s1832_s8] sm:$0xff] %v1121_v60 }
 0x3d7   :  { %1124 = vst [vmem:[%s1832_s8 + $0x8] sm:$0xff] %v1122_v61 }
 0x3d8   :  { %1129 = vsyncpa [#allocation3], 1 }
 0x3d9   :  { %1130 = vsyncpa [#allocation5], 1 }

</bundles_post_ra>
